<compile_context>
chip_gen: v6e
topology: v6e:2x2x1
jax: 0.10.0
libtpu: 0.0.40
codegen_flags: <defaults>
</compile_context>

<pallas_src>
import math

import jax
import jax.numpy as jnp
from jax import lax
from jax.experimental import pallas as pl
from jax.experimental.pallas import tpu as pltpu

_SQRT1_2 = 1.0 / math.sqrt(2.0)


def _mlp_proj_kernel(x_ref, w1_ref, b1_ref, w2_ref, b2_ref, g_ref, beta_ref, o_ref):
    # x arrives f32 (no wrapper-side cast pass); cast to bf16 right at the MXU.
    x = x_ref[...].astype(jnp.bfloat16)

    # ---- Linear 1: bf16 operands on the MXU, f32 accumulation ----
    h = jnp.dot(x, w1_ref[...], preferred_element_type=jnp.float32)
    h = h + b1_ref[...]

    # ---- GELU (exact erf form == torch.nn.GELU() default), f32 ----
    h = 0.5 * h * (1.0 + lax.erf(h * _SQRT1_2))

    # ---- Linear 2: bf16 operands on the MXU, f32 accumulation ----
    y = jnp.dot(h.astype(jnp.bfloat16), w2_ref[...],
                preferred_element_type=jnp.float32)
    y = y + b2_ref[...]

    # ---- LayerNorm over last dim (eps=1e-5, biased variance == torch default) ----
    mu = jnp.mean(y, axis=-1, keepdims=True)
    yc = y - mu
    var = jnp.mean(yc * yc, axis=-1, keepdims=True)
    out = yc * lax.rsqrt(var + 1e-5) * g_ref[...] + beta_ref[...]

    o_ref[...] = out.astype(o_ref.dtype)


def prepare_mlp_proj_params(w1, b1, w2, b2, ln_gamma, ln_beta):
    """One-time (model-init) parameter prep.

    Weights are expected [in, out] (transpose of PyTorch's [out, in]) and are
    persisted as bf16 so every forward pays only 2 B/elem of HBM traffic for
    the dominant bytes. Bias / LayerNorm params stay f32 as [1, dim] rows.
    """
    d_in = w1.shape[0]
    d_out = w2.shape[1]
    return dict(
        w1=w1.astype(jnp.bfloat16),
        b1=b1.reshape(1, d_in).astype(jnp.float32),
        w2=w2.astype(jnp.bfloat16),
        b2=b2.reshape(1, d_out).astype(jnp.float32),
        gamma=ln_gamma.reshape(1, d_out).astype(jnp.float32),
        beta=ln_beta.reshape(1, d_out).astype(jnp.float32),
    )


def _pick_batch_tile(B, max_tb=256):
    """Single grid step for small B (no pad / no slice); row tiles for large B.

    For B > max_tb the grid has >= 2 parallel steps, so v7x's two TensorCores
    both get real work via dimension_semantics=("parallel",).
    """
    if B <= max_tb:
        return B, 1
    return max_tb, pl.cdiv(B, max_tb)


def mlp_proj_model(image_embeds, params, *, out_dtype=jnp.float32, max_tb=256):
    """IP-Adapter MLPProjModel forward: LN(GELU(x@W1+b1)@W2+b2). x: [B, clip_dim]."""
    B, d_in = image_embeds.shape
    d_out = params["w2"].shape[1]
    tb, n_tiles = _pick_batch_tile(B, max_tb)

    out_bytes = jnp.dtype(out_dtype).itemsize
    # Explicit VMEM budget: double-buffered activation tiles + (double-buffered)
    # resident params + f32 intermediates, with headroom. Clamped so the same
    # kernel is portable to v5e (16 MiB default scoped) and v7x (64 MiB total).
    need = (2 * tb * d_in * 4 + 2 * tb * d_out * out_bytes
            + 2 * (d_in * d_in * 2 + d_in * d_out * 2 + (d_in + 3 * d_out) * 4)
            + 2 * tb * max(d_in, d_out) * 4)
    vmem_limit = int(min(max(2 * need, 16 << 20), 64 << 20))

    # Advisory cost hint so XLA schedules this small custom call sensibly.
    cost = pl.CostEstimate(
        flops=2 * B * d_in * (d_in + d_out),
        transcendentals=B * d_in,  # one erf per hidden element
        bytes_accessed=(B * d_in * 4                       # x (f32, cast in-kernel)
                        + d_in * d_in * 2 + d_in * d_out * 2  # bf16 weights
                        + (d_in + 3 * d_out) * 4               # bias / LN params
                        + B * d_out * out_bytes),              # output
    )

    return pl.pallas_call(
        _mlp_proj_kernel,
        out_shape=jax.ShapeDtypeStruct((B, d_out), out_dtype),
        grid=(n_tiles,),
        in_specs=[
            pl.BlockSpec((tb, d_in), lambda i: (i, 0)),      # x: tiled over batch
            pl.BlockSpec((d_in, d_in), lambda i: (0, 0)),    # w1: VMEM-resident
            pl.BlockSpec((1, d_in), lambda i: (0, 0)),       # b1
            pl.BlockSpec((d_in, d_out), lambda i: (0, 0)),   # w2: VMEM-resident
            pl.BlockSpec((1, d_out), lambda i: (0, 0)),      # b2
            pl.BlockSpec((1, d_out), lambda i: (0, 0)),      # ln_gamma
            pl.BlockSpec((1, d_out), lambda i: (0, 0)),      # ln_beta
        ],
        out_specs=pl.BlockSpec((tb, d_out), lambda i: (i, 0)),
        compiler_params=pltpu.CompilerParams(
            dimension_semantics=("parallel",),
            vmem_limit_bytes=vmem_limit),
        cost_estimate=cost,
    )(image_embeds.astype(jnp.float32), params["w1"], params["b1"],
      params["w2"], params["b2"], params["gamma"], params["beta"])


if __name__ == "__main__":
    # Small, lane-friendly sizes consistent with the module's __init__
    # (clip_embeddings_dim -> 256, cross_attention_dim -> 128). B=32 collapses
    # to a single grid step (tb=B): no padding, no output slice.
    B, CLIP_DIM, CROSS_DIM = 32, 256, 128

    key = jax.random.PRNGKey(0)
    kx, kw1, kb1, kw2, kb2 = jax.random.split(key, 5)

    x = jax.random.normal(kx, (B, CLIP_DIM), dtype=jnp.float32)

    # Deterministic synthetic parameters (Linear stored as [in, out]).
    w1 = jax.random.normal(kw1, (CLIP_DIM, CLIP_DIM), jnp.float32) * (1.0 / math.sqrt(CLIP_DIM))
    b1 = jax.random.normal(kb1, (CLIP_DIM,), jnp.float32) * 0.02
    w2 = jax.random.normal(kw2, (CLIP_DIM, CROSS_DIM), jnp.float32) * (1.0 / math.sqrt(CLIP_DIM))
    b2 = jax.random.normal(kb2, (CROSS_DIM,), jnp.float32) * 0.02
    ln_gamma = jnp.ones((CROSS_DIM,), jnp.float32)    # torch LayerNorm default init
    ln_beta = jnp.zeros((CROSS_DIM,), jnp.float32)

    # One-time weight prep (bf16 persist) outside the hot path.
    params = prepare_mlp_proj_params(w1, b1, w2, b2, ln_gamma, ln_beta)

    out = mlp_proj_model(x, params)
    jax.block_until_ready(out)

    # Pure-JAX reference with the same bf16-matmul / f32-accumulate precision.
    h_ref = jnp.dot(x.astype(jnp.bfloat16), w1.astype(jnp.bfloat16),
                    preferred_element_type=jnp.float32) + b1
    h_ref = 0.5 * h_ref * (1.0 + lax.erf(h_ref / math.sqrt(2.0)))
    y_ref = jnp.dot(h_ref.astype(jnp.bfloat16), w2.astype(jnp.bfloat16),
                    preferred_element_type=jnp.float32) + b2
    mu = y_ref.mean(-1, keepdims=True)
    var = ((y_ref - mu) ** 2).mean(-1, keepdims=True)
    ref = (y_ref - mu) * lax.rsqrt(var + 1e-5) * ln_gamma + ln_beta

    assert out.shape == (B, CROSS_DIM)
    err = float(jnp.max(jnp.abs(out - ref)))
    assert jnp.allclose(out, ref, atol=2e-2, rtol=2e-2), err
    print("KERNEL_OK")
</pallas_src>

<mosaic_0001>
module attributes {stable_mosaic.version = 11 : i64} {
  func.func @_mlp_proj_kernel(%arg0: i32, %arg1: memref<32x256xf32, #tpu.memory_space<vmem>>, %arg2: memref<256x256xbf16, #tpu.memory_space<vmem>>, %arg3: memref<1x256xf32, #tpu.memory_space<vmem>>, %arg4: memref<256x128xbf16, #tpu.memory_space<vmem>>, %arg5: memref<1x128xf32, #tpu.memory_space<vmem>>, %arg6: memref<1x128xf32, #tpu.memory_space<vmem>>, %arg7: memref<1x128xf32, #tpu.memory_space<vmem>>, %arg8: memref<32x128xf32, #tpu.memory_space<vmem>>) attributes {dimension_semantics = [#tpu.dimension_semantics<parallel>], iteration_bounds = array<i64: 1>, scalar_prefetch = 0 : i64, scratch_operands = 0 : i64, tpu.core_type = #tpu.core_type<tc>, window_params = [{transform_indices = @transform_0, window_bounds = array<i64: 32, 256>}, {pipeline_mode = #tpu.pipeline_mode<synchronous>, transform_indices = @transform_1, window_bounds = array<i64: 256, 256>}, {pipeline_mode = #tpu.pipeline_mode<synchronous>, transform_indices = @transform_2, window_bounds = array<i64: 1, 256>}, {pipeline_mode = #tpu.pipeline_mode<synchronous>, transform_indices = @transform_3, window_bounds = array<i64: 256, 128>}, {pipeline_mode = #tpu.pipeline_mode<synchronous>, transform_indices = @transform_4, window_bounds = array<i64: 1, 128>}, {pipeline_mode = #tpu.pipeline_mode<synchronous>, transform_indices = @transform_5, window_bounds = array<i64: 1, 128>}, {pipeline_mode = #tpu.pipeline_mode<synchronous>, transform_indices = @transform_6, window_bounds = array<i64: 1, 128>}, {transform_indices = @transform_7, window_bounds = array<i64: 32, 128>}]} {
    %c0 = arith.constant 0 : index
    %c0_0 = arith.constant 0 : index
    %0 = vector.load %arg1[%c0, %c0_0] : memref<32x256xf32, #tpu.memory_space<vmem>>, vector<32x256xf32>
    %1 = arith.truncf %0 : vector<32x256xf32> to vector<32x256xbf16>
    %c0_1 = arith.constant 0 : index
    %c0_2 = arith.constant 0 : index
    %2 = vector.load %arg2[%c0_1, %c0_2] : memref<256x256xbf16, #tpu.memory_space<vmem>>, vector<256x256xbf16>
    %cst = arith.constant dense<0.000000e+00> : vector<32x256xf32>
    %3 = tpu.matmul %1, %2, %cst {dimension_numbers = #tpu.dot_dimension_numbers<[1], [0], [0], [1], [0, 0, 1, 1], [], []>} : vector<32x256xbf16>, vector<256x256xbf16>, vector<32x256xf32> -> vector<32x256xf32>
    %c0_3 = arith.constant 0 : index
    %c0_4 = arith.constant 0 : index
    %4 = vector.load %arg3[%c0_3, %c0_4] : memref<1x256xf32, #tpu.memory_space<vmem>>, vector<1x256xf32>
    %5 = vector.broadcast %4 : vector<1x256xf32> to vector<32x256xf32>
    %6 = arith.addf %3, %5 : vector<32x256xf32>
    %cst_5 = arith.constant 5.000000e-01 : f32
    %7 = vector.broadcast %cst_5 : f32 to vector<32x256xf32>
    %8 = arith.mulf %7, %6 : vector<32x256xf32>
    %cst_6 = arith.constant 0.707106769 : f32
    %9 = vector.broadcast %cst_6 : f32 to vector<32x256xf32>
    %10 = arith.mulf %6, %9 : vector<32x256xf32>
    %11 = math.erf %10 : vector<32x256xf32>
    %cst_7 = arith.constant 1.000000e+00 : f32
    %12 = vector.broadcast %cst_7 : f32 to vector<32x256xf32>
    %13 = arith.addf %12, %11 : vector<32x256xf32>
    %14 = arith.mulf %8, %13 : vector<32x256xf32>
    %15 = arith.truncf %14 : vector<32x256xf32> to vector<32x256xbf16>
    %c0_8 = arith.constant 0 : index
    %c0_9 = arith.constant 0 : index
    %16 = vector.load %arg4[%c0_8, %c0_9] : memref<256x128xbf16, #tpu.memory_space<vmem>>, vector<256x128xbf16>
    %cst_10 = arith.constant dense<0.000000e+00> : vector<32x128xf32>
    %17 = tpu.matmul %15, %16, %cst_10 {dimension_numbers = #tpu.dot_dimension_numbers<[1], [0], [0], [1], [0, 0, 1, 1], [], []>} : vector<32x256xbf16>, vector<256x128xbf16>, vector<32x128xf32> -> vector<32x128xf32>
    %c0_11 = arith.constant 0 : index
    %c0_12 = arith.constant 0 : index
    %18 = vector.load %arg5[%c0_11, %c0_12] : memref<1x128xf32, #tpu.memory_space<vmem>>, vector<1x128xf32>
    %19 = vector.broadcast %18 : vector<1x128xf32> to vector<32x128xf32>
    %20 = arith.addf %17, %19 : vector<32x128xf32>
    %cst_13 = arith.constant dense<0.000000e+00> : vector<32xf32>
    %21 = vector.multi_reduction <add>, %20, %cst_13 [1] : vector<32x128xf32> to vector<32xf32>
    %22 = vector.shape_cast %21 : vector<32xf32> to vector<32x1xf32>
    %cst_14 = arith.constant 1.280000e+02 : f32
    %23 = vector.broadcast %cst_14 : f32 to vector<32x1xf32>
    %24 = arith.divf %22, %23 : vector<32x1xf32>
    %25 = vector.broadcast %24 : vector<32x1xf32> to vector<32x128xf32>
    %26 = arith.subf %20, %25 : vector<32x128xf32>
    %27 = arith.mulf %26, %26 : vector<32x128xf32>
    %cst_15 = arith.constant dense<0.000000e+00> : vector<32xf32>
    %28 = vector.multi_reduction <add>, %27, %cst_15 [1] : vector<32x128xf32> to vector<32xf32>
    %29 = vector.shape_cast %28 : vector<32xf32> to vector<32x1xf32>
    %cst_16 = arith.constant 1.280000e+02 : f32
    %30 = vector.broadcast %cst_16 : f32 to vector<32x1xf32>
    %31 = arith.divf %29, %30 : vector<32x1xf32>
    %cst_17 = arith.constant 9.99999974E-6 : f32
    %32 = vector.broadcast %cst_17 : f32 to vector<32x1xf32>
    %33 = arith.addf %31, %32 : vector<32x1xf32>
    %34 = math.rsqrt %33 : vector<32x1xf32>
    %35 = vector.broadcast %34 : vector<32x1xf32> to vector<32x128xf32>
    %36 = arith.mulf %26, %35 : vector<32x128xf32>
    %c0_18 = arith.constant 0 : index
    %c0_19 = arith.constant 0 : index
    %37 = vector.load %arg6[%c0_18, %c0_19] : memref<1x128xf32, #tpu.memory_space<vmem>>, vector<1x128xf32>
    %38 = vector.broadcast %37 : vector<1x128xf32> to vector<32x128xf32>
    %39 = arith.mulf %36, %38 : vector<32x128xf32>
    %c0_20 = arith.constant 0 : index
    %c0_21 = arith.constant 0 : index
    %40 = vector.load %arg7[%c0_20, %c0_21] : memref<1x128xf32, #tpu.memory_space<vmem>>, vector<1x128xf32>
    %41 = vector.broadcast %40 : vector<1x128xf32> to vector<32x128xf32>
    %42 = arith.addf %39, %41 : vector<32x128xf32>
    %c0_22 = arith.constant 0 : index
    %c0_23 = arith.constant 0 : index
    %43 = vector.load %arg8[%c0_22, %c0_23] : memref<32x128xf32, #tpu.memory_space<vmem>>, vector<32x128xf32>
    tpu.vector_store %arg8[%c0_22, %c0_23], %42 {strides = array<i32>} : memref<32x128xf32, #tpu.memory_space<vmem>>, vector<32x128xf32>,
    return
  }
  func.func @transform_0(%arg0: i32) -> (i32, i32) {
    %c0_i32 = arith.constant 0 : i32
    %c0_i32_0 = arith.constant 0 : i32
    return %arg0, %c0_i32 : i32, i32
  }
  func.func @transform_1(%arg0: i32) -> (i32, i32) {
    %c0_i32 = arith.constant 0 : i32
    %c0_i32_0 = arith.constant 0 : i32
    %c0_i32_1 = arith.constant 0 : i32
    return %c0_i32, %c0_i32_0 : i32, i32
  }
  func.func @transform_2(%arg0: i32) -> (i32, i32) {
    %c0_i32 = arith.constant 0 : i32
    %c0_i32_0 = arith.constant 0 : i32
    %c0_i32_1 = arith.constant 0 : i32
    return %c0_i32, %c0_i32_0 : i32, i32
  }
  func.func @transform_3(%arg0: i32) -> (i32, i32) {
    %c0_i32 = arith.constant 0 : i32
    %c0_i32_0 = arith.constant 0 : i32
    %c0_i32_1 = arith.constant 0 : i32
    return %c0_i32, %c0_i32_0 : i32, i32
  }
  func.func @transform_4(%arg0: i32) -> (i32, i32) {
    %c0_i32 = arith.constant 0 : i32
    %c0_i32_0 = arith.constant 0 : i32
    %c0_i32_1 = arith.constant 0 : i32
    return %c0_i32, %c0_i32_0 : i32, i32
  }
  func.func @transform_5(%arg0: i32) -> (i32, i32) {
    %c0_i32 = arith.constant 0 : i32
    %c0_i32_0 = arith.constant 0 : i32
    %c0_i32_1 = arith.constant 0 : i32
    return %c0_i32, %c0_i32_0 : i32, i32
  }
  func.func @transform_6(%arg0: i32) -> (i32, i32) {
    %c0_i32 = arith.constant 0 : i32
    %c0_i32_0 = arith.constant 0 : i32
    %c0_i32_1 = arith.constant 0 : i32
    return %c0_i32, %c0_i32_0 : i32, i32
  }
  func.func @transform_7(%arg0: i32) -> (i32, i32) {
    %c0_i32 = arith.constant 0 : i32
    %c0_i32_0 = arith.constant 0 : i32
    return %arg0, %c0_i32 : i32, i32
  }
}

</mosaic_0001>

<bundles_post_ra>
// kernel: tpu_custom_call.1
= control target key start
LH: loop header
LB: loop body
LE: loop exit
PB: predicated region body
PF: predicated region fallthrough
CT: control target
= control target key end

     0   :  { %12 = vsyncpa [#allocation3], 0  ;;  %s998_s0 = inlined_call_operand.hbm [shape: f32[32,256], index: 0, kind: input, shape index: {}]   ;;  %s999_s1 = inlined_call_operand.hbm [shape: bf16[256,256], index: 1, kind: input, shape index: {}]   ;;  %s1000_s2 = inlined_call_operand.vmem [shape: f32[1,256], index: 2, kind: input, shape index: {}]   ;;  %s1001_s3 = inlined_call_operand.hbm [shape: bf16[256,128], index: 3, kind: input, shape index: {}]   ;;  %s1002_s4 = inlined_call_operand.vmem [shape: f32[1,128], index: 4, kind: input, shape index: {}]   ;;  %s1003_s5 = inlined_call_operand.vmem [shape: f32[1,128], index: 5, kind: input, shape index: {}]   ;;  %s1004_s6 = inlined_call_operand.vmem [shape: f32[1,128], index: 6, kind: input, shape index: {}]   ;;  %s1005_s7 = inlined_call_operand.hbm [shape: f32[32,128], index: 7, kind: output, shape index: {}]  }
   0x1   :  { %13 = vsyncpa [#allocation6], 0 }
   0x2   :  { %14 = vsyncpa [#allocation4], 0  ;;  %s918_s24 = smov [#allocation5]  }
   0x3   :  { %s32_s25 = sshll.u32 %s918_s24, 4  ;;  %s33_s25 = int_to_ptr.vmem [resolvable:$true] %s32_s25 }
   0x4   :  { %s840_s26 = scalar_lea.vmem %s33_s25, 4096  ;;  %p845_p1 = scmp.lt.s32.totalorder %s33_s25, %s33_s25 }
   0x5   :  { %p841_p0 = scmp.ne.s32.totalorder %s33_s25, %s840_s26  ;;  %p846_p2 = scmp.lt.s32.totalorder %s840_s26, %s840_s26 }
   0x7   :  { %p847_p3 = por %p846_p2, %p845_p1 }
   0x9   :  { %p848_p4 = pnand %p847_p3, %p841_p0 }
   0xb   :  { %851 = shalt.err (!%p848_p4)
}
   0xc   :  { %s919_s27 = smov 128   ;;  %s920_s28 = smov 8  }
   0xd   :  { %38 = dma.hbm_to_vmem [thread:$0]  %s999_s1, 4096, %s33_s25, [#allocation6], %s919_s27, %s919_s27, %s920_s28  }
   0xe   :  { %s921_s8 = smov [#allocation2]  }
   0xf   :  { %s20_s9 = sshll.u32 %s921_s8, 4  ;;  %s21_s9 = int_to_ptr.vmem [resolvable:$true] %s20_s9 }
  0x10   :  { %s860_s10 = scalar_lea.vmem %s21_s9, 1024  ;;  %p865_p6 = scmp.lt.s32.totalorder %s21_s9, %s21_s9 }
  0x11   :  { %p861_p5 = scmp.ne.s32.totalorder %s21_s9, %s860_s10  ;;  %p866_p7 = scmp.lt.s32.totalorder %s860_s10, %s860_s10 }
  0x13   :  { %p867_p8 = por %p866_p7, %p865_p6 }
  0x15   :  { %p868_p9 = pnand %p867_p8, %p861_p5 }
  0x17   :  { %871 = shalt.err (!%p868_p9)
}
  0x18   :  { %s922_s11 = smov 256   ;;  %s923_s12 = smov 16  }
  0x19   :  { %26 = dma.hbm_to_vmem [thread:$0]  %s998_s0, 1024, %s21_s9, [#allocation3], %s922_s11, %s922_s11, %s923_s12  }
  0x1a   :  { %s924_s15 = smov [#allocation7]  }
  0x1b   :  { %s46_s16 = sshll.u32 %s924_s15, 4  ;;  %s47_s16 = int_to_ptr.vmem [resolvable:$true] %s46_s16 }
  0x1c   :  { %s880_s1 = scalar_lea.vmem %s47_s16, 2048  ;;  %p885_p11 = scmp.lt.s32.totalorder %s47_s16, %s47_s16 }
  0x1d   :  { %p881_p10 = scmp.ne.s32.totalorder %s47_s16, %s880_s1  ;;  %p886_p12 = scmp.lt.s32.totalorder %s880_s1, %s880_s1 }
  0x1f   :  { %p887_p13 = por %p886_p12, %p885_p11 }
  0x21   :  { %p888_p0 = pnand %p887_p13, %p881_p10 }
  0x23   :  { %891 = shalt.err (!%p888_p0)
}
  0x24   :  { %s925_s17 = smov 64   ;;  %s926_s18 = smov 4  }
  0x25   :  { %52 = dma.hbm_to_vmem [thread:$0]  %s1001_s3, 2048, %s47_s16, [#allocation6], %s925_s17, %s925_s17, %s926_s18  }
  0x26   :  { %912 = dma.done.wait [#allocation3], 1024  }
  0x27   :  { %913 = vsyncadd [#allocation3], 4294966272 }
  0x28   :  { %914 = dma.done.wait [#allocation6], 6144  }
  0x29   :  { %915 = vsyncadd [#allocation6], 4294961152  ;;  %v744_v0 = vld [vmem:[#allocation5 + $0x74] ss:$8 sps:$4 sm:$0xff]   ;;  %v746_v1 = vld [vmem:[#allocation5 + $0x70] ss:$8 sps:$4 sm:$0xff]   ;;  %v115_v60 = vlaneseq }
  0x2a   :  { %285 = vmatprep.subr.bf16.mxu0 %v744_v0  ;;  %v747_v2 = vld [vmem:[#allocation5 + $0x64] ss:$8 sps:$4 sm:$0xff]   ;;  %v749_v3 = vld [vmem:[#allocation5 + $0x60] ss:$8 sps:$4 sm:$0xff]   ;;  %v750_v4 = vld [vmem:[#allocation5 + $0x54] ss:$8 sps:$4 sm:$0xff]  }
  0x2b   :  { %286 = vmatpush1.bf16.msra.mxu0 %v746_v1  ;;  %v752_v5 = vld [vmem:[#allocation5 + $0x50] ss:$8 sps:$4 sm:$0xff]   ;;  %v753_v6 = vld [vmem:[#allocation5 + $0x44] ss:$8 sps:$4 sm:$0xff]   ;;  %v755_v7 = vld [vmem:[#allocation5 + $0x40] ss:$8 sps:$4 sm:$0xff]  }
  0x2c   :  { %287 = vmatprep.subr.bf16.mxu0 %v747_v2  ;;  %v756_v8 = vld [vmem:[#allocation5 + $0x34] ss:$8 sps:$4 sm:$0xff]   ;;  %v758_v9 = vld [vmem:[#allocation5 + $0x30] ss:$8 sps:$4 sm:$0xff]   ;;  %v759_v10 = vld [vmem:[#allocation5 + $0x24] ss:$8 sps:$4 sm:$0xff]  }
  0x2d   :  { %v761_v11 = vld [vmem:[#allocation5 + $0x20] ss:$8 sps:$4 sm:$0xff]   ;;  %v762_v12 = vld [vmem:[#allocation5 + $0x14] ss:$8 sps:$4 sm:$0xff]   ;;  %v764_v16 = vld [vmem:[#allocation5 + $0x10] ss:$8 sps:$4 sm:$0xff]  }
  0x2e   :  { %v70_v13 = vld [vmem:[#allocation2 + $0x8] sm:$0xff]  ;;  %v72_v14 = vld [vmem:[#allocation2 + $0x18] sm:$0xff]  ;;  %v69_v35 = vld [vmem:[#allocation2] sm:$0xff]  ;;  %v116_v61 = vshrl.u32 %v115_v60, 7 }
  0x2f   :  { %288 = vmatpush1.bf16.msra.mxu0 %v749_v3  ;;  %v78_v15 = vpack.c.bf16 %v72_v14, %v70_v13  ;;  %v765_v17 = vld [vmem:[#allocation5 + $0x4] ss:$8 sps:$4 sm:$0xff]   ;;  %v767_v18 = vld [vmem:[#allocation5] ss:$8 sps:$4 sm:$0xff]   ;;  %v768_v19 = vld [vmem:[#allocation5 + $0xf4] ss:$8 sps:$4 sm:$0xff]  }
  0x30   :  { %289 = vmatprep.subr.bf16.mxu0 %v750_v4  ;;  %v770_v20 = vld [vmem:[#allocation5 + $0xf0] ss:$8 sps:$4 sm:$0xff]   ;;  %v771_v21 = vld [vmem:[#allocation5 + $0xe4] ss:$8 sps:$4 sm:$0xff]   ;;  %v773_v22 = vld [vmem:[#allocation5 + $0xe0] ss:$8 sps:$4 sm:$0xff]  }
  0x31   :  { %317 = vmatprep.mubr.bf16.mxu0 %v78_v15  ;;  %v774_v23 = vld [vmem:[#allocation5 + $0xd4] ss:$8 sps:$4 sm:$0xff]   ;;  %v776_v24 = vld [vmem:[#allocation5 + $0xd0] ss:$8 sps:$4 sm:$0xff]   ;;  %v777_v25 = vld [vmem:[#allocation5 + $0xc4] ss:$8 sps:$4 sm:$0xff]  }
  0x32   :  { %v779_v26 = vld [vmem:[#allocation5 + $0xc0] ss:$8 sps:$4 sm:$0xff]   ;;  %v780_v27 = vld [vmem:[#allocation5 + $0xb4] ss:$8 sps:$4 sm:$0xff]   ;;  %v782_v28 = vld [vmem:[#allocation5 + $0xb0] ss:$8 sps:$4 sm:$0xff]  }
  0x33   :  { %290 = vmatpush1.bf16.msra.mxu0 %v752_v5  ;;  %v783_v29 = vld [vmem:[#allocation5 + $0xa4] ss:$8 sps:$4 sm:$0xff]   ;;  %v785_v30 = vld [vmem:[#allocation5 + $0xa0] ss:$8 sps:$4 sm:$0xff]   ;;  %v786_v31 = vld [vmem:[#allocation5 + $0x94] ss:$8 sps:$4 sm:$0xff]  }
  0x34   :  { %291 = vmatprep.subr.bf16.mxu0 %v753_v6  ;;  %v788_v32 = vld [vmem:[#allocation5 + $0x90] ss:$8 sps:$4 sm:$0xff]   ;;  %v789_v33 = vld [vmem:[#allocation5 + $0x84] ss:$8 sps:$4 sm:$0xff]   ;;  %v791_v34 = vld [vmem:[#allocation5 + $0x80] ss:$8 sps:$4 sm:$0xff]  }
  0x35   :  { %v71_v36 = vld [vmem:[#allocation2 + $0x10] sm:$0xff]  ;;  %v74_v37 = vld [vmem:[#allocation2 + $0x28] sm:$0xff]  ;;  %v76_v38 = vld [vmem:[#allocation2 + $0x38] sm:$0xff]  ;;  %v117_v62 = vsub.s32 0, %v116_v61  ;;  %v121_v0 = vsub.s32 1, %v116_v61 }
  0x36   :  { %v77_v39 = vpack.c.bf16 %v71_v36, %v69_v35  ;;  %v80_v40 = vpack.c.bf16 %v76_v38, %v74_v37  ;;  %v73_v41 = vld [vmem:[#allocation2 + $0x20] sm:$0xff]  ;;  %v75_v42 = vld [vmem:[#allocation2 + $0x30] sm:$0xff]  ;;  %v792_v44 = vld [vmem:[#allocation7 + $0x78] sm:$0xff]  }
  0x37   :  { %292 = vmatpush1.bf16.msra.mxu0 %v755_v7  ;;  %v79_v43 = vpack.c.bf16 %v75_v42, %v73_v41  ;;  %v793_v45 = vld [vmem:[#allocation7 + $0x38] sm:$0xff]   ;;  %706 = vmatprep.subr.bf16.mxu1 %v792_v44  ;;  %v794_v46 = vld [vmem:[#allocation7 + $0x70] sm:$0xff]   ;;  %v796_v48 = vld [vmem:[#allocation7 + $0x68] sm:$0xff]  }
  0x38   :  { %293 = vmatprep.subr.bf16.mxu0 %v756_v8  ;;  %707 = vmatpush3.bf16.msra.mxu1 %v793_v45  ;;  %v795_v47 = vld [vmem:[#allocation7 + $0x30] sm:$0xff]   ;;  %v797_v49 = vld [vmem:[#allocation7 + $0x28] sm:$0xff]   ;;  %v798_v50 = vld [vmem:[#allocation7 + $0x60] sm:$0xff]  }
  0x39   :  { %708 = vmatprep.subr.bf16.mxu1 %v794_v46  ;;  %v799_v51 = vld [vmem:[#allocation7 + $0x20] sm:$0xff]   ;;  %v800_v52 = vld [vmem:[#allocation7 + $0x58] sm:$0xff]   ;;  %v802_v54 = vld [vmem:[#allocation7 + $0x50] sm:$0xff]  }
  0x3a   :  { %v801_v53 = vld [vmem:[#allocation7 + $0x18] sm:$0xff]   ;;  %v803_v55 = vld [vmem:[#allocation7 + $0x10] sm:$0xff]   ;;  %v804_v56 = vld [vmem:[#allocation7 + $0x48] sm:$0xff]  }
  0x3b   :  { %294 = vmatpush1.bf16.msra.mxu0 %v758_v9  ;;  %v805_v57 = vld [vmem:[#allocation7 + $0x8] sm:$0xff]   ;;  %v806_v58 = vld [vmem:[#allocation7 + $0x40] sm:$0xff]  }
  0x3c   :  { %295 = vmatprep.subr.bf16.mxu0 %v759_v10  ;;  %709 = vmatpush3.bf16.msra.mxu1 %v795_v47  ;;  %v807_v59 = vld [vmem:[#allocation7] sm:$0xff]  }
  0x3d   :  { %710 = vmatprep.subr.bf16.mxu1 %v796_v48  ;;  %v113_v63 = vld [vmem:[%s1000_s2] sm:$0x3] }
  0x3e   :  { %v118_v1 = vrot.slane %v113_v63, %v117_v62  ;;  %v122_v2 = vrot.slane %v113_v63, %v121_v0 }
  0x3f   :  { %296 = vmatpush1.bf16.msra.mxu0 %v761_v11 }
  0x40   :  { %297 = vmatprep.subr.bf16.mxu0 %v762_v12  ;;  %711 = vmatpush3.bf16.msra.mxu1 %v797_v49 }
  0x41   :  { %712 = vmatprep.subr.bf16.mxu1 %v798_v50 }
  0x43   :  { %298 = vmatpush1.bf16.msra.mxu0 %v764_v16 }
  0x44   :  { %299 = vmatprep.subr.bf16.mxu0 %v765_v17  ;;  %713 = vmatpush3.bf16.msra.mxu1 %v799_v51 }
  0x45   :  { %714 = vmatprep.subr.bf16.mxu1 %v800_v52 }
  0x47   :  { %300 = vmatpush1.bf16.msra.mxu0 %v767_v18 }
  0x48   :  { %301 = vmatprep.subr.bf16.mxu0 %v768_v19  ;;  %715 = vmatpush3.bf16.msra.mxu1 %v801_v53 }
  0x49   :  { %716 = vmatprep.subr.bf16.mxu1 %v802_v54 }
  0x4b   :  { %302 = vmatpush2.bf16.msra.mxu0 %v770_v20 }
  0x4c   :  { %303 = vmatprep.subr.bf16.mxu0 %v771_v21  ;;  %717 = vmatpush3.bf16.msra.mxu1 %v803_v55 }
  0x4d   :  { %718 = vmatprep.subr.bf16.mxu1 %v804_v56 }
  0x4f   :  { %304 = vmatpush2.bf16.msra.mxu0 %v773_v22 }
  0x50   :  { %305 = vmatprep.subr.bf16.mxu0 %v774_v23  ;;  %719 = vmatpush3.bf16.msra.mxu1 %v805_v57 }
  0x51   :  { %720 = vmatprep.subr.bf16.mxu1 %v806_v58 }
  0x53   :  { %306 = vmatpush2.bf16.msra.mxu0 %v776_v24 }
  0x54   :  { %307 = vmatprep.subr.bf16.mxu0 %v777_v25  ;;  %721 = vmatpush3.bf16.msra.mxu1 %v807_v59 }
  0x57   :  { %308 = vmatpush2.bf16.msra.mxu0 %v779_v26 }
  0x58   :  { %309 = vmatprep.subr.bf16.mxu0 %v780_v27 }
  0x5b   :  { %310 = vmatpush2.bf16.msra.mxu0 %v782_v28 }
  0x5c   :  { %311 = vmatprep.subr.bf16.mxu0 %v783_v29 }
  0x5f   :  { %312 = vmatpush2.bf16.msra.mxu0 %v785_v30 }
  0x60   :  { %313 = vmatprep.subr.bf16.mxu0 %v786_v31 }
  0x63   :  { %314 = vmatpush2.bf16.msra.mxu0 %v788_v32 }
  0x64   :  { %315 = vmatprep.subr.bf16.mxu0 %v789_v33 }
  0x67   :  { %316 = vmatpush2.bf16.msra.mxu0 %v791_v34 }
  0x6a   :  { %318 = vmatmul.mubr.bf16.vlgmr.msra.gmra.mxu0 %v77_v39 }
  0x6b   :  { %327 = vmatprep.mubr.bf16.mxu0 %v80_v40 }
  0x72   :  { %328 = vmatmul.mubr.bf16.gmra.mxu0 %v79_v43 }
 0x12a   :  { %v319_v3 = vpop.f32.mrf.mxu0 }
 0x12b   :  { %v320_v4 = vadd.f32 %v319_v3, %v118_v1 }
 0x12c   :  { %v321_v5 = vpop.f32.mrf.mxu0 }
 0x12d   :  { %v322_v6 = vadd.f32 %v321_v5, %v122_v2  ;;  %v346_v7 = vmul.f32 0.70710677, %v320_v4  ;;  %v338_v38 = vmul.f32 0.5, %v320_v4 }
 0x12e   :  { %v323_v8 = vpop.f32.mrf.mxu0 }
 0x12f   :  { %v347_v9 = vmul.f32 0.70710677, %v322_v6  ;;  %v324_v10 = vadd.f32 %v323_v8, %v118_v1  ;;  %v339_v35 = vmul.f32 0.5, %v322_v6 }
 0x130   :  { %v325_v11 = vpop.f32.mrf.mxu0 }
 0x131   :  { %808 = verf.f32 %v347_v9  ;;  %v348_v12 = vmul.f32 0.70710677, %v324_v10  ;;  %v326_v13 = vadd.f32 %v325_v11, %v122_v2  ;;  %v340_v34 = vmul.f32 0.5, %v324_v10 }
 0x132   :  { %810 = verf.f32 %v346_v7  ;;  %v329_v14 = vpop.f32.mrf.mxu0 }
 0x133   :  { %812 = verf.f32 %v348_v12  ;;  %v349_v15 = vmul.f32 0.70710677, %v326_v13  ;;  %v330_v16 = vadd.f32 %v329_v14, %v118_v1  ;;  %v341_v36 = vmul.f32 0.5, %v326_v13 }
 0x134   :  { %v331_v17 = vpop.f32.mrf.mxu0 }
 0x135   :  { %814 = verf.f32 %v349_v15  ;;  %v332_v18 = vadd.f32 %v331_v17, %v122_v2  ;;  %v350_v19 = vmul.f32 0.70710677, %v330_v16  ;;  %v342_v56 = vmul.f32 0.5, %v330_v16 }
 0x136   :  { %v333_v20 = vpop.f32.mrf.mxu0 }
 0x137   :  { %v351_v21 = vmul.f32 0.70710677, %v332_v18  ;;  %v334_v22 = vadd.f32 %v333_v20, %v118_v1  ;;  %v343_v53 = vmul.f32 0.5, %v332_v18  ;;  %v687_v1 = vld [vmem:[%s1002_s4] ss:$0 sm:$0xff] }
 0x138   :  { %v335_v23 = vpop.f32.mrf.mxu0 }
 0x139   :  { %816 = verf.f32 %v351_v21  ;;  %v352_v24 = vmul.f32 0.70710677, %v334_v22  ;;  %v336_v25 = vadd.f32 %v335_v23, %v122_v2  ;;  %v344_v52 = vmul.f32 0.5, %v334_v22 }
 0x13a   :  { %818 = verf.f32 %v350_v19 }
 0x13b   :  { %820 = verf.f32 %v352_v24  ;;  %v353_v26 = vmul.f32 0.70710677, %v336_v25  ;;  %v345_v54 = vmul.f32 0.5, %v336_v25 }
 0x13d   :  { %822 = verf.f32 %v353_v26 }
 0x13e   :  { %v809_v27 = vpop.eup %808 }
 0x13f   :  { %v811_v28 = vpop.eup %810  ;;  %v363_v31 = vadd.f32 1.0, %v809_v27 }
 0x140   :  { %v813_v29 = vpop.eup %812  ;;  %v362_v33 = vadd.f32 1.0, %v811_v28 }
 0x141   :  { %v364_v30 = vadd.f32 1.0, %v813_v29  ;;  %v371_v40 = vmul.f32 %v363_v31, %v339_v35 }
 0x142   :  { %v815_v32 = vpop.eup %814  ;;  %v370_v43 = vmul.f32 %v362_v33, %v338_v38 }
 0x143   :  { %v365_v37 = vadd.f32 1.0, %v815_v32  ;;  %v372_v39 = vmul.f32 %v364_v30, %v340_v34 }
 0x145   :  { %v373_v41 = vmul.f32 %v365_v37, %v341_v36  ;;  %v378_v47 = vpack.c.bf16 %v372_v39, %v370_v43 }
 0x146   :  { %v817_v42 = vpop.eup %816 }
 0x147   :  { %v819_v44 = vpop.eup %818  ;;  %v379_v45 = vpack.c.bf16 %v373_v41, %v371_v40  ;;  %v367_v48 = vadd.f32 1.0, %v817_v42 }
 0x148   :  { %v821_v46 = vpop.eup %820  ;;  %v366_v51 = vadd.f32 1.0, %v819_v44 }
 0x149   :  { %v368_v49 = vadd.f32 1.0, %v821_v46  ;;  %549 = vmatprep.mubr.bf16.mxu1 %v379_v45  ;;  %v375_v58 = vmul.f32 %v367_v48, %v343_v53  ;;  %v704_v45 = vld [vmem:[%s1003_s5] ss:$0 sm:$0xff]  ;;  %s927_s5 = smov [#allocation8]  }
 0x14a   :  { %v823_v50 = vpop.eup %822  ;;  %550 = vmatmul.mubr.bf16.vlgmr.msra.gmra.mxu1 %v378_v47  ;;  %v374_v60 = vmul.f32 %v366_v51, %v342_v56  ;;  %v705_v47 = vld [vmem:[%s1004_s6] ss:$0 sm:$0xff]  ;;  %s642_s25 = sshll.u32 %s927_s5, 4  ;;  %s643_s25 = int_to_ptr.vmem [resolvable:$true] %s642_s25 }
 0x14b   :  { %v369_v55 = vadd.f32 1.0, %v823_v50  ;;  %v376_v57 = vmul.f32 %v368_v49, %v344_v52  ;;  %s892_s6 = scalar_lea.vmem %s643_s25, 512  ;;  %p897_p2 = scmp.lt.s32.totalorder %s643_s25, %s643_s25 }
 0x14c   :  { %p893_p1 = scmp.ne.s32.totalorder %s643_s25, %s892_s6  ;;  %p898_p3 = scmp.lt.s32.totalorder %s892_s6, %s892_s6 }
 0x14d   :  { %v377_v59 = vmul.f32 %v369_v55, %v345_v54  ;;  %v380_v62 = vpack.c.bf16 %v376_v57, %v374_v60 }
 0x14e   :  { %p899_p4 = por %p898_p3, %p897_p2 }
 0x14f   :  { %v381_v61 = vpack.c.bf16 %v377_v59, %v375_v58 }
 0x150   :  { %p900_p5 = pnand %p899_p4, %p893_p1 }
 0x151   :  { %557 = vmatprep.mubr.bf16.mxu1 %v381_v61 }
 0x152   :  { %558 = vmatmul.mubr.bf16.gmra.mxu1 %v380_v62 }
 0x20a   :  { %v722_v63 = vpop.f32.mrf.mxu1 }
 0x20c   :  { %v723_v0 = vpop.f32.mrf.mxu1 }
 0x20d   :  { %v724_v2 = vadd.f32 %v723_v0, %v722_v63 }
 0x20e   :  { %v725_v3 = vpop.f32.mrf.mxu1 }
 0x20f   :  { %v552_v4 = vadd.f32 %v724_v2, %v687_v1 }
 0x210   :  { %v726_v5 = vpop.f32.mrf.mxu1 }
 0x211   :  { %v727_v6 = vadd.f32 %v726_v5, %v725_v3  ;;  %566 = vadd.xlane.f32.xlu0 %v552_v4 }
 0x212   :  { %v728_v7 = vpop.f32.mrf.mxu1 }
 0x213   :  { %v555_v8 = vadd.f32 %v727_v6, %v687_v1 }
 0x214   :  { %v729_v9 = vpop.f32.mrf.mxu1 }
 0x215   :  { %v730_v10 = vadd.f32 %v729_v9, %v728_v7  ;;  %568 = vadd.xlane.f32.xlu0 %v555_v8 }
 0x216   :  { %v731_v11 = vpop.f32.mrf.mxu1 }
 0x217   :  { %v560_v12 = vadd.f32 %v730_v10, %v687_v1 }
 0x218   :  { %v732_v13 = vpop.f32.mrf.mxu1 }
 0x219   :  { %v733_v14 = vadd.f32 %v732_v13, %v731_v11  ;;  %570 = vadd.xlane.f32.xlu1 %v560_v12 }
 0x21b   :  { %v563_v15 = vadd.f32 %v733_v14, %v687_v1 }
 0x21d   :  { %572 = vadd.xlane.f32.xlu1 %v563_v15 }
 0x29a   :  { %v567_v16 = vpop.xlane.xlu0 %566 }
 0x29b   :  { %v575_v17 = vmul.f32 0.0078125, %v567_v16 }
 0x29d   :  { %v579_v18 = vsub.f32 %v552_v4, %v575_v17 }
 0x29e   :  { %v569_v19 = vpop.xlane.xlu0 %568 }
 0x29f   :  { %v576_v20 = vmul.f32 0.0078125, %v569_v19  ;;  %v583_v21 = vmul.f32 %v579_v18, %v579_v18 }
 0x2a1   :  { %v580_v22 = vsub.f32 %v555_v8, %v576_v20  ;;  %587 = vadd.xlane.f32.xlu0 %v583_v21 }
 0x2a2   :  { %v571_v23 = vpop.xlane.xlu1 %570 }
 0x2a3   :  { %v577_v24 = vmul.f32 0.0078125, %v571_v23  ;;  %v584_v25 = vmul.f32 %v580_v22, %v580_v22 }
 0x2a5   :  { %v581_v26 = vsub.f32 %v560_v12, %v577_v24  ;;  %589 = vadd.xlane.f32.xlu1 %v584_v25 }
 0x2a6   :  { %v573_v27 = vpop.xlane.xlu1 %572 }
 0x2a7   :  { %v578_v28 = vmul.f32 0.0078125, %v573_v27  ;;  %v585_v29 = vmul.f32 %v581_v26, %v581_v26 }
 0x2a9   :  { %v582_v30 = vsub.f32 %v563_v15, %v578_v28  ;;  %591 = vadd.xlane.f32.xlu0 %v585_v29 }
 0x2ab   :  { %v586_v31 = vmul.f32 %v582_v30, %v582_v30 }
 0x2ad   :  { %593 = vadd.xlane.f32.xlu1 %v586_v31 }
 0x32a   :  { %v588_v32 = vpop.xlane.xlu0 %587 }
 0x32b   :  { %v595_v33 = vmul.f32 0.0078125, %v588_v32 }
 0x32d   :  { %v599_v34 = vadd.f32 1e-05, %v595_v33 }
 0x32e   :  { %v590_v35 = vpop.xlane.xlu1 %589 }
 0x32f   :  { %824 = vrsqrt.f32 %v599_v34  ;;  %v596_v36 = vmul.f32 0.0078125, %v590_v35 }
 0x331   :  { %v600_v37 = vadd.f32 1e-05, %v596_v36 }
 0x332   :  { %v592_v38 = vpop.xlane.xlu0 %591 }
 0x333   :  { %826 = vrsqrt.f32 %v600_v37  ;;  %v597_v39 = vmul.f32 0.0078125, %v592_v38 }
 0x335   :  { %v601_v40 = vadd.f32 1e-05, %v597_v39 }
 0x336   :  { %v594_v41 = vpop.xlane.xlu1 %593 }
 0x337   :  { %828 = vrsqrt.f32 %v601_v40  ;;  %v598_v42 = vmul.f32 0.0078125, %v594_v41 }
 0x339   :  { %v602_v43 = vadd.f32 1e-05, %v598_v42 }
 0x33b   :  { %830 = vrsqrt.f32 %v602_v43 }
 0x33c   :  { %v825_v44 = vpop.eup %824 }
 0x33d   :  { %v607_v46 = vmul.f32 %v825_v44, %v579_v18 }
 0x33f   :  { %v618_v48 = vmul.f32 %v704_v45, %v607_v46 }
 0x340   :  { %v827_v49 = vpop.eup %826 }
 0x341   :  { %v608_v50 = vmul.f32 %v827_v49, %v580_v22  ;;  %v629_v51 = vadd.f32 %v705_v47, %v618_v48 }
 0x343   :  { %v619_v52 = vmul.f32 %v704_v45, %v608_v50  ;;  %633 = vst [vmem:[#allocation8] sm:$0xff] %v629_v51 }
 0x344   :  { %v829_v53 = vpop.eup %828 }
 0x345   :  { %v609_v54 = vmul.f32 %v829_v53, %v581_v26  ;;  %v630_v55 = vadd.f32 %v705_v47, %v619_v52 }
 0x347   :  { %v620_v56 = vmul.f32 %v704_v45, %v609_v54  ;;  %634 = vst [vmem:[#allocation8 + $0x8] sm:$0xff] %v630_v55 }
 0x348   :  { %v831_v57 = vpop.eup %830 }
 0x349   :  { %v610_v58 = vmul.f32 %v831_v57, %v582_v30  ;;  %v631_v59 = vadd.f32 %v705_v47, %v620_v56 }
 0x34b   :  { %v621_v60 = vmul.f32 %v704_v45, %v610_v58  ;;  %635 = vst [vmem:[#allocation8 + $0x10] sm:$0xff] %v631_v59 }
 0x34d   :  { %v632_v61 = vadd.f32 %v705_v47, %v621_v60 }
 0x34f   :  { %636 = vst [vmem:[#allocation8 + $0x18] sm:$0xff] %v632_v61 }
 0x350   :  { %903 = shalt.err (!%p900_p5)
}
 0x351   :  { %648 = dma.vmem_to_hbm [thread:$0]  %s643_s25, 512, %s1005_s7, [#allocation4], %s919_s27, %s919_s27, %s920_s28  }
 0x352   :  { %916 = dma.done.wait [#allocation4], 512  }
 0x353   :  { %917 = vsyncadd [#allocation4], 4294966784 }
 0x354   :  { %652 = vsyncpa [#allocation3], 1 }
 0x355   :  { %653 = vsyncpa [#allocation6], 1 }
 0x356   :  { %654 = vsyncpa [#allocation4], 1 }

</bundles_post_ra>
